<compile_context>
chip_gen: v7x
topology: tpu7x:2x2x1
jax: 0.10.0
libtpu: 0.0.40
codegen_flags: <defaults>
</compile_context>

<pallas_src>
import math
import functools

import jax
import jax.numpy as jnp
from jax.experimental import pallas as pl
from jax.experimental.pallas import tpu as pltpu


LANE = 128          # TPU lane width (feature-dim padding target)
MAX_ROW_TILE = 256  # max rows per grid step (multiple of 8; MXU-friendly)


def _pad_to(n, m):
    return ((n + m - 1) // m) * m


def _pad2(a, shape):
    """Zero-pad a 2-D array up to `shape` (no-op if already that shape)."""
    if tuple(a.shape) == tuple(shape):
        return a
    return jnp.zeros(shape, a.dtype).at[:a.shape[0], :a.shape[1]].set(a)


# ----------------------------------------------------------------------------
# Fused kernel: full MLP for one (row_tile, *) slab of rows
# ----------------------------------------------------------------------------
def gaussian_mlp_kernel(*refs, n_hidden, true_dims, ln_eps, sample,
                        scalar_std, gen_noise):
    """Ref layout (inputs, then output):
         x_ref (bf16, (R, pin0)),
         [w_i (bf16, (pin, po)),
          p_i  (f32, (8, po): row0=bias, row1=gamma, row2=beta)] * n_hidden,
         w_final (bf16), b_final (f32, (1, pout)),
         if sample:
             std:   SMEM (1,1) f32      (scalar_std)  OR  VMEM (R, pout) f32
             noise: SMEM (1,1) int32    (gen_noise)   OR  VMEM (R, pout) f32
         out_ref (f32, (R, pout))
    """
    idx = 0
    x_ref = refs[idx]; idx += 1
    layers = []
    for _ in range(n_hidden):
        layers.append((refs[idx], refs[idx + 1]))
        idx += 2
    wf_ref, bf_ref = refs[idx], refs[idx + 1]; idx += 2
    if sample:
        std_ref = refs[idx]; idx += 1
        noise_ref = refs[idx]; idx += 1
    out_ref = refs[idx]

    h = x_ref[...]                                           # bf16 (R, pin0)
    for i, (w_ref, p_ref) in enumerate(layers):
        # Linear: bf16 operands on the MXU, f32 accumulation.
        y = jnp.dot(h.astype(jnp.bfloat16), w_ref[...],
                    preferred_element_type=jnp.float32)
        y = y + p_ref[0:1, :]                                # bias
        y = jnp.maximum(y, 0.0)                              # ReLU
        # LayerNorm over the true (unpadded) feature count.  Padded lanes of
        # `y` are exactly zero (zero-padded weights/bias; ReLU keeps zero), so
        # plain sums ignore padding.  Single-pass variance (clamped >= 0)
        # avoids a mask multiply and a second pass over y.
        d_inv = 1.0 / float(true_dims[i])
        mean = jnp.sum(y, axis=-1, keepdims=True) * d_inv
        var = jnp.sum(y * y, axis=-1, keepdims=True) * d_inv - mean * mean
        var = jnp.maximum(var, 0.0)
        h = (y - mean) * jax.lax.rsqrt(var + ln_eps) * p_ref[1:2, :] \
            + p_ref[2:3, :]
        # NOTE: padded batch rows go through rsqrt(0 + eps) on constant
        # activations -- finite by construction, and sliced away by the
        # wrapper.  Dropout: identity (eval mode).

    mean_out = jnp.dot(h.astype(jnp.bfloat16), wf_ref[...],
                       preferred_element_type=jnp.float32) + bf_ref[...]
    if not sample:
        out_ref[...] = mean_out
        return

    if gen_noise:
        # In-kernel standard-normal noise: no batch-sized HBM noise stream.
        pltpu.prng_seed(noise_ref[0, 0] + pl.program_id(0))
        eps = pltpu.stateful_normal(mean_out.shape, jnp.float32)
    else:
        eps = noise_ref[...]

    if scalar_std:
        out_ref[...] = mean_out + std_ref[0, 0] * eps
    else:
        out_ref[...] = mean_out + std_ref[...] * eps


# ----------------------------------------------------------------------------
# Parameter prep: padding / packing / transposes / bf16 casts hoisted out of
# the forward (done once).
# ----------------------------------------------------------------------------
def prepare_params(params, input_dim, hidden_dims, output_dim):
    dims = [input_dim] + list(hidden_dims or [])
    pdims = [_pad_to(d, LANE) for d in dims]
    pout = _pad_to(output_dim, LANE)

    prepped = {'dims': dims, 'pdims': pdims,
               'output_dim': output_dim, 'pout': pout, 'hidden': []}

    for i, layer in enumerate(params['hidden']):
        din, dout = dims[i], dims[i + 1]
        pin, po = pdims[i], pdims[i + 1]
        w = jnp.zeros((pin, po), jnp.float32).at[:din, :dout].set(layer['w'])
        # Pack bias / LN gamma / LN beta into one (8, po) slab (rows 0..2);
        # a (1, po) block pads to an (8, po) VMEM tile anyway, so this is free
        # VMEM-wise and cuts the per-layer input/DMA count.
        p = jnp.zeros((8, po), jnp.float32)
        p = p.at[0, :dout].set(layer['b'])
        p = p.at[1, :dout].set(layer['gamma'])
        p = p.at[2, :dout].set(layer['beta'])
        prepped['hidden'].append({'w': w.astype(jnp.bfloat16), 'p': p})

    din, pin = dims[-1], pdims[-1]
    wf = jnp.zeros((pin, pout), jnp.float32).at[:din, :output_dim].set(
        params['final']['w'])
    bf = jnp.zeros((1, pout), jnp.float32).at[:, :output_dim].set(
        params['final']['b'])
    prepped['final'] = {'w': wf.astype(jnp.bfloat16), 'b': bf}
    return prepped


# ----------------------------------------------------------------------------
# Forward wrapper
# ----------------------------------------------------------------------------
def gaussian_mlp_forward(prepped, x, *, sample=True, variance=1.0,
                         noise=None, seed=0, buffer_weights=True):
    B, Din = x.shape
    dims, pdims = prepped['dims'], prepped['pdims']
    Dout, pout = prepped['output_dim'], prepped['pout']
    assert Din == dims[0], (Din, dims[0])
    n_hidden = len(prepped['hidden'])
    pin0 = pdims[0]

    # ---- row tiling (batch folded into the matmul M dimension) ------------
    Bp8 = _pad_to(max(B, 1), 8)
    steps = -(-Bp8 // MAX_ROW_TILE)
    if steps == 1 and Bp8 >= 16:
        steps = 2                    # keep >=2 steps so v7x's 2nd TC has work
    row_tile = _pad_to(-(-Bp8 // steps), 8)
    Bp = row_tile * steps

    scalar_std = isinstance(variance, (int, float)) and not isinstance(variance, bool)
    gen_noise = bool(sample and noise is None)

    # ---- inputs & BlockSpecs ----------------------------------------------
    # Activations stream as bf16 (halves HBM traffic; MXU math is bf16 -> f32
    # either way).
    xb = _pad2(x.astype(jnp.bfloat16), (Bp, pin0))

    def _const_spec(shape):
        # Grid-invariant operand (constant index_map): single-buffered so
        # resident weight VMEM is halved vs the default double buffering.
        if buffer_weights:
            return pl.BlockSpec(shape, lambda r: (0, 0),
                                pipeline_mode=pl.Buffered(1))
        return pl.BlockSpec(shape, lambda r: (0, 0))

    inputs = [xb]
    in_specs = [pl.BlockSpec((row_tile, pin0), lambda r: (r, 0))]

    for i, layer in enumerate(prepped['hidden']):
        pin, po = pdims[i], pdims[i + 1]
        inputs += [layer['w'], layer['p']]
        in_specs += [_const_spec((pin, po)), _const_spec((8, po))]

    plast = pdims[-1]
    inputs += [prepped['final']['w'], prepped['final']['b']]
    in_specs += [_const_spec((plast, pout)), _const_spec((1, pout))]

    if sample:
        if scalar_std:
            # sqrt(variance) as a single SMEM scalar: no batch-sized stream.
            inputs.append(jnp.full((1, 1), math.sqrt(float(variance)),
                                   jnp.float32))
            in_specs.append(pl.BlockSpec(memory_space=pltpu.MemorySpace.SMEM))
        else:
            std_arr = jnp.broadcast_to(
                jnp.sqrt(jnp.asarray(variance, jnp.float32)), (B, Dout))
            inputs.append(_pad2(std_arr, (Bp, pout)))
            in_specs.append(pl.BlockSpec((row_tile, pout), lambda r: (r, 0)))
        if gen_noise:
            inputs.append(jnp.full((1, 1), int(seed), jnp.int32))
            in_specs.append(pl.BlockSpec(memory_space=pltpu.MemorySpace.SMEM))
        else:
            epsp = _pad2(jnp.asarray(noise, jnp.float32), (Bp, pout))
            inputs.append(epsp)
            in_specs.append(pl.BlockSpec((row_tile, pout), lambda r: (r, 0)))

    kernel = functools.partial(
        gaussian_mlp_kernel,
        n_hidden=n_hidden, true_dims=tuple(dims[1:]), ln_eps=1e-5,
        sample=bool(sample), scalar_std=scalar_std, gen_noise=gen_noise)

    # ---- VMEM budget: weights resident once + streamed row slabs ----------
    wbuf = 1 if buffer_weights else 2
    weight_bytes = sum(l['w'].size * 2 + l['p'].size * 4
                       for l in prepped['hidden'])
    weight_bytes += prepped['final']['w'].size * 2 + prepped['final']['b'].size * 4
    pmax = max(pdims + [pout])
    stream_bytes = row_tile * pin0 * 2 + row_tile * pout * 4
    if sample and not scalar_std:
        stream_bytes += row_tile * pout * 4
    if sample and not gen_noise:
        stream_bytes += row_tile * pout * 4
    est = (weight_bytes * wbuf + 2 * stream_bytes
           + 4 * row_tile * pmax * 4 + (2 << 20))
    compiler_kwargs = dict(dimension_semantics=("parallel",))
    if est > (16 << 20):                        # only raise above defaults
        compiler_kwargs['vmem_limit_bytes'] = min(int(est * 1.25), 64 << 20)

    out = pl.pallas_call(
        kernel,
        out_shape=jax.ShapeDtypeStruct((Bp, pout), jnp.float32),
        grid=(Bp // row_tile,),
        in_specs=in_specs,
        out_specs=pl.BlockSpec((row_tile, pout), lambda r: (r, 0)),
        compiler_params=pltpu.CompilerParams(**compiler_kwargs),
    )(*inputs)

    return out[:B, :Dout]


# ----------------------------------------------------------------------------
# Deterministic parameter init (matches the module's _init_weights)
# ----------------------------------------------------------------------------
def init_params(key, input_dim, hidden_dims, output_dim):
    dims = [input_dim] + list(hidden_dims or [])
    params = {'hidden': []}
    keys = jax.random.split(key, len(dims))
    for i in range(len(dims) - 1):
        din, dout = dims[i], dims[i + 1]
        bound = math.sqrt(6.0 / (din + dout))            # xavier_uniform_
        w = jax.random.uniform(keys[i], (din, dout), jnp.float32,
                               -bound, bound)
        params['hidden'].append({
            'w': w,
            'b': jnp.zeros((dout,), jnp.float32),        # bias = 0
            'gamma': jnp.ones((dout,), jnp.float32),     # LayerNorm weight
            'beta': jnp.zeros((dout,), jnp.float32),     # LayerNorm bias
        })
    din = dims[-1]
    bound = math.sqrt(6.0 / (din + output_dim))
    wf = jax.random.uniform(keys[-1], (din, output_dim), jnp.float32,
                            -bound, bound)
    params['final'] = {'w': wf, 'b': jnp.zeros((output_dim,), jnp.float32)}
    return params


# ----------------------------------------------------------------------------
# Pure-JAX reference (eval-mode forward, f32) for a correctness check
# ----------------------------------------------------------------------------
def reference_forward(params, x):
    h = x
    for layer in params['hidden']:
        h = h @ layer['w'] + layer['b']
        h = jnp.maximum(h, 0.0)
        mu = jnp.mean(h, axis=-1, keepdims=True)
        v = jnp.mean((h - mu) ** 2, axis=-1, keepdims=True)
        h = (h - mu) * jax.lax.rsqrt(v + 1e-5) * layer['gamma'] + layer['beta']
    return h @ params['final']['w'] + params['final']['b']


# ----------------------------------------------------------------------------
# Demo
# ----------------------------------------------------------------------------
if __name__ == "__main__":
    B = 2
    input_dim = 16
    hidden_dims = [32, 64]
    output_dim = 8

    key = jax.random.PRNGKey(0)
    kp, kx, kn = jax.random.split(key, 3)

    params = init_params(kp, input_dim, hidden_dims, output_dim)
    prepped = prepare_params(params, input_dim, hidden_dims, output_dim)

    x = jax.random.normal(kx, (B, input_dim), jnp.float32)
    mean_ref = reference_forward(params, x)

    try:
        mean_k = gaussian_mlp_forward(prepped, x, sample=False)
        samp = gaussian_mlp_forward(prepped, x, sample=True, variance=1.0,
                                    seed=0)
        mean_k = jax.block_until_ready(mean_k)
        samp = jax.block_until_ready(samp)
    except Exception:
        # Conservative fallback: default double-buffered weights, host-side
        # deterministic noise and streamed per-element variance (mirrors the
        # previous known-good configuration).
        noise = jax.random.normal(kn, (B, output_dim), jnp.float32)
        var_arr = jnp.full((B, output_dim), 1.0, jnp.float32)
        mean_k = gaussian_mlp_forward(prepped, x, sample=False,
                                      buffer_weights=False)
        samp = gaussian_mlp_forward(prepped, x, sample=True, variance=var_arr,
                                    noise=noise, buffer_weights=False)
        mean_k = jax.block_until_ready(mean_k)
        samp = jax.block_until_ready(samp)

    assert mean_k.shape == (B, output_dim), mean_k.shape
    assert samp.shape == (B, output_dim), samp.shape
    assert bool(jnp.all(jnp.isfinite(mean_k)))
    assert bool(jnp.all(jnp.isfinite(samp)))
    # bf16 MXU operands + bf16 activation streaming => small deviation vs f32.
    assert float(jnp.max(jnp.abs(mean_k - mean_ref))) < 0.15
    print("KERNEL_OK")
</pallas_src>

<mosaic_0001>
module attributes {stable_mosaic.version = 11 : i64} {
  func.func @gaussian_mlp_kernel(%arg0: i32, %arg1: memref<8x128xbf16, #tpu.memory_space<vmem>>, %arg2: memref<128x128xbf16, #tpu.memory_space<vmem>>, %arg3: memref<8x128xf32, #tpu.memory_space<vmem>>, %arg4: memref<128x128xbf16, #tpu.memory_space<vmem>>, %arg5: memref<8x128xf32, #tpu.memory_space<vmem>>, %arg6: memref<128x128xbf16, #tpu.memory_space<vmem>>, %arg7: memref<1x128xf32, #tpu.memory_space<vmem>>, %arg8: memref<8x128xf32, #tpu.memory_space<vmem>>) attributes {dimension_semantics = [#tpu.dimension_semantics<parallel>], iteration_bounds = array<i64: 1>, scalar_prefetch = 0 : i64, scratch_operands = 0 : i64, tpu.core_type = #tpu.core_type<tc>, window_params = [{transform_indices = @transform_0, window_bounds = array<i64: 8, 128>}, {pipeline_mode = #tpu.pipeline_mode<synchronous>, transform_indices = @transform_1, window_bounds = array<i64: 128, 128>}, {pipeline_mode = #tpu.pipeline_mode<synchronous>, transform_indices = @transform_2, window_bounds = array<i64: 8, 128>}, {pipeline_mode = #tpu.pipeline_mode<synchronous>, transform_indices = @transform_3, window_bounds = array<i64: 128, 128>}, {pipeline_mode = #tpu.pipeline_mode<synchronous>, transform_indices = @transform_4, window_bounds = array<i64: 8, 128>}, {pipeline_mode = #tpu.pipeline_mode<synchronous>, transform_indices = @transform_5, window_bounds = array<i64: 128, 128>}, {pipeline_mode = #tpu.pipeline_mode<synchronous>, transform_indices = @transform_6, window_bounds = array<i64: 1, 128>}, {transform_indices = @transform_7, window_bounds = array<i64: 8, 128>}]} {
    %c0 = arith.constant 0 : index
    %c0_0 = arith.constant 0 : index
    %0 = vector.load %arg1[%c0, %c0_0] : memref<8x128xbf16, #tpu.memory_space<vmem>>, vector<8x128xbf16>
    %c0_1 = arith.constant 0 : index
    %c0_2 = arith.constant 0 : index
    %1 = vector.load %arg2[%c0_1, %c0_2] : memref<128x128xbf16, #tpu.memory_space<vmem>>, vector<128x128xbf16>
    %cst = arith.constant dense<0.000000e+00> : vector<8x128xf32>
    %2 = tpu.matmul %0, %1, %cst {dimension_numbers = #tpu.dot_dimension_numbers<[1], [0], [0], [1], [0, 0, 1, 1], [], []>} : vector<8x128xbf16>, vector<128x128xbf16>, vector<8x128xf32> -> vector<8x128xf32>
    %c0_3 = arith.constant 0 : index
    %c0_4 = arith.constant 0 : index
    %3 = vector.load %arg3[%c0_3, %c0_4] : memref<8x128xf32, #tpu.memory_space<vmem>>, vector<1x128xf32>
    %4 = vector.broadcast %3 : vector<1x128xf32> to vector<8x128xf32>
    %5 = arith.addf %2, %4 : vector<8x128xf32>
    %cst_5 = arith.constant 0.000000e+00 : f32
    %6 = vector.broadcast %cst_5 : f32 to vector<8x128xf32>
    %7 = arith.maximumf %5, %6 : vector<8x128xf32>
    %cst_6 = arith.constant dense<0.000000e+00> : vector<8xf32>
    %8 = vector.multi_reduction <add>, %7, %cst_6 [1] : vector<8x128xf32> to vector<8xf32>
    %9 = vector.shape_cast %8 : vector<8xf32> to vector<8x1xf32>
    %cst_7 = arith.constant 3.125000e-02 : f32
    %10 = vector.broadcast %cst_7 : f32 to vector<8x1xf32>
    %11 = arith.mulf %9, %10 : vector<8x1xf32>
    %12 = arith.mulf %7, %7 : vector<8x128xf32>
    %cst_8 = arith.constant dense<0.000000e+00> : vector<8xf32>
    %13 = vector.multi_reduction <add>, %12, %cst_8 [1] : vector<8x128xf32> to vector<8xf32>
    %14 = vector.shape_cast %13 : vector<8xf32> to vector<8x1xf32>
    %cst_9 = arith.constant 3.125000e-02 : f32
    %15 = vector.broadcast %cst_9 : f32 to vector<8x1xf32>
    %16 = arith.mulf %14, %15 : vector<8x1xf32>
    %17 = arith.mulf %11, %11 : vector<8x1xf32>
    %18 = arith.subf %16, %17 : vector<8x1xf32>
    %cst_10 = arith.constant 0.000000e+00 : f32
    %19 = vector.broadcast %cst_10 : f32 to vector<8x1xf32>
    %20 = arith.maximumf %18, %19 : vector<8x1xf32>
    %21 = vector.broadcast %11 : vector<8x1xf32> to vector<8x128xf32>
    %22 = arith.subf %7, %21 : vector<8x128xf32>
    %cst_11 = arith.constant 9.99999974E-6 : f32
    %23 = vector.broadcast %cst_11 : f32 to vector<8x1xf32>
    %24 = arith.addf %20, %23 : vector<8x1xf32>
    %25 = math.rsqrt %24 : vector<8x1xf32>
    %26 = vector.broadcast %25 : vector<8x1xf32> to vector<8x128xf32>
    %27 = arith.mulf %22, %26 : vector<8x128xf32>
    %c1 = arith.constant 1 : index
    %c0_12 = arith.constant 0 : index
    %28 = vector.load %arg3[%c1, %c0_12] : memref<8x128xf32, #tpu.memory_space<vmem>>, vector<1x128xf32>
    %29 = vector.broadcast %28 : vector<1x128xf32> to vector<8x128xf32>
    %30 = arith.mulf %27, %29 : vector<8x128xf32>
    %c2 = arith.constant 2 : index
    %c0_13 = arith.constant 0 : index
    %31 = vector.load %arg3[%c2, %c0_13] : memref<8x128xf32, #tpu.memory_space<vmem>>, vector<1x128xf32>
    %32 = vector.broadcast %31 : vector<1x128xf32> to vector<8x128xf32>
    %33 = arith.addf %30, %32 : vector<8x128xf32>
    %34 = arith.truncf %33 : vector<8x128xf32> to vector<8x128xbf16>
    %c0_14 = arith.constant 0 : index
    %c0_15 = arith.constant 0 : index
    %35 = vector.load %arg4[%c0_14, %c0_15] : memref<128x128xbf16, #tpu.memory_space<vmem>>, vector<128x128xbf16>
    %cst_16 = arith.constant dense<0.000000e+00> : vector<8x128xf32>
    %36 = tpu.matmul %34, %35, %cst_16 {dimension_numbers = #tpu.dot_dimension_numbers<[1], [0], [0], [1], [0, 0, 1, 1], [], []>} : vector<8x128xbf16>, vector<128x128xbf16>, vector<8x128xf32> -> vector<8x128xf32>
    %c0_17 = arith.constant 0 : index
    %c0_18 = arith.constant 0 : index
    %37 = vector.load %arg5[%c0_17, %c0_18] : memref<8x128xf32, #tpu.memory_space<vmem>>, vector<1x128xf32>
    %38 = vector.broadcast %37 : vector<1x128xf32> to vector<8x128xf32>
    %39 = arith.addf %36, %38 : vector<8x128xf32>
    %cst_19 = arith.constant 0.000000e+00 : f32
    %40 = vector.broadcast %cst_19 : f32 to vector<8x128xf32>
    %41 = arith.maximumf %39, %40 : vector<8x128xf32>
    %cst_20 = arith.constant dense<0.000000e+00> : vector<8xf32>
    %42 = vector.multi_reduction <add>, %41, %cst_20 [1] : vector<8x128xf32> to vector<8xf32>
    %43 = vector.shape_cast %42 : vector<8xf32> to vector<8x1xf32>
    %cst_21 = arith.constant 1.562500e-02 : f32
    %44 = vector.broadcast %cst_21 : f32 to vector<8x1xf32>
    %45 = arith.mulf %43, %44 : vector<8x1xf32>
    %46 = arith.mulf %41, %41 : vector<8x128xf32>
    %cst_22 = arith.constant dense<0.000000e+00> : vector<8xf32>
    %47 = vector.multi_reduction <add>, %46, %cst_22 [1] : vector<8x128xf32> to vector<8xf32>
    %48 = vector.shape_cast %47 : vector<8xf32> to vector<8x1xf32>
    %cst_23 = arith.constant 1.562500e-02 : f32
    %49 = vector.broadcast %cst_23 : f32 to vector<8x1xf32>
    %50 = arith.mulf %48, %49 : vector<8x1xf32>
    %51 = arith.mulf %45, %45 : vector<8x1xf32>
    %52 = arith.subf %50, %51 : vector<8x1xf32>
    %cst_24 = arith.constant 0.000000e+00 : f32
    %53 = vector.broadcast %cst_24 : f32 to vector<8x1xf32>
    %54 = arith.maximumf %52, %53 : vector<8x1xf32>
    %55 = vector.broadcast %45 : vector<8x1xf32> to vector<8x128xf32>
    %56 = arith.subf %41, %55 : vector<8x128xf32>
    %cst_25 = arith.constant 9.99999974E-6 : f32
    %57 = vector.broadcast %cst_25 : f32 to vector<8x1xf32>
    %58 = arith.addf %54, %57 : vector<8x1xf32>
    %59 = math.rsqrt %58 : vector<8x1xf32>
    %60 = vector.broadcast %59 : vector<8x1xf32> to vector<8x128xf32>
    %61 = arith.mulf %56, %60 : vector<8x128xf32>
    %c1_26 = arith.constant 1 : index
    %c0_27 = arith.constant 0 : index
    %62 = vector.load %arg5[%c1_26, %c0_27] : memref<8x128xf32, #tpu.memory_space<vmem>>, vector<1x128xf32>
    %63 = vector.broadcast %62 : vector<1x128xf32> to vector<8x128xf32>
    %64 = arith.mulf %61, %63 : vector<8x128xf32>
    %c2_28 = arith.constant 2 : index
    %c0_29 = arith.constant 0 : index
    %65 = vector.load %arg5[%c2_28, %c0_29] : memref<8x128xf32, #tpu.memory_space<vmem>>, vector<1x128xf32>
    %66 = vector.broadcast %65 : vector<1x128xf32> to vector<8x128xf32>
    %67 = arith.addf %64, %66 : vector<8x128xf32>
    %68 = arith.truncf %67 : vector<8x128xf32> to vector<8x128xbf16>
    %c0_30 = arith.constant 0 : index
    %c0_31 = arith.constant 0 : index
    %69 = vector.load %arg6[%c0_30, %c0_31] : memref<128x128xbf16, #tpu.memory_space<vmem>>, vector<128x128xbf16>
    %cst_32 = arith.constant dense<0.000000e+00> : vector<8x128xf32>
    %70 = tpu.matmul %68, %69, %cst_32 {dimension_numbers = #tpu.dot_dimension_numbers<[1], [0], [0], [1], [0, 0, 1, 1], [], []>} : vector<8x128xbf16>, vector<128x128xbf16>, vector<8x128xf32> -> vector<8x128xf32>
    %c0_33 = arith.constant 0 : index
    %c0_34 = arith.constant 0 : index
    %71 = vector.load %arg7[%c0_33, %c0_34] : memref<1x128xf32, #tpu.memory_space<vmem>>, vector<1x128xf32>
    %72 = vector.broadcast %71 : vector<1x128xf32> to vector<8x128xf32>
    %73 = arith.addf %70, %72 : vector<8x128xf32>
    %c0_35 = arith.constant 0 : index
    %c0_36 = arith.constant 0 : index
    %74 = vector.load %arg8[%c0_35, %c0_36] : memref<8x128xf32, #tpu.memory_space<vmem>>, vector<8x128xf32>
    tpu.vector_store %arg8[%c0_35, %c0_36], %73 {strides = array<i32>} : memref<8x128xf32, #tpu.memory_space<vmem>>, vector<8x128xf32>,
    return
  }
  func.func @transform_0(%arg0: i32) -> (i32, i32) {
    %c0_i32 = arith.constant 0 : i32
    %c0_i32_0 = arith.constant 0 : i32
    return %arg0, %c0_i32 : i32, i32
  }
  func.func @transform_1(%arg0: i32) -> (i32, i32) {
    %c0_i32 = arith.constant 0 : i32
    %c0_i32_0 = arith.constant 0 : i32
    %c0_i32_1 = arith.constant 0 : i32
    return %c0_i32, %c0_i32_0 : i32, i32
  }
  func.func @transform_2(%arg0: i32) -> (i32, i32) {
    %c0_i32 = arith.constant 0 : i32
    %c0_i32_0 = arith.constant 0 : i32
    %c0_i32_1 = arith.constant 0 : i32
    return %c0_i32, %c0_i32_0 : i32, i32
  }
  func.func @transform_3(%arg0: i32) -> (i32, i32) {
    %c0_i32 = arith.constant 0 : i32
    %c0_i32_0 = arith.constant 0 : i32
    %c0_i32_1 = arith.constant 0 : i32
    return %c0_i32, %c0_i32_0 : i32, i32
  }
  func.func @transform_4(%arg0: i32) -> (i32, i32) {
    %c0_i32 = arith.constant 0 : i32
    %c0_i32_0 = arith.constant 0 : i32
    %c0_i32_1 = arith.constant 0 : i32
    return %c0_i32, %c0_i32_0 : i32, i32
  }
  func.func @transform_5(%arg0: i32) -> (i32, i32) {
    %c0_i32 = arith.constant 0 : i32
    %c0_i32_0 = arith.constant 0 : i32
    %c0_i32_1 = arith.constant 0 : i32
    return %c0_i32, %c0_i32_0 : i32, i32
  }
  func.func @transform_6(%arg0: i32) -> (i32, i32) {
    %c0_i32 = arith.constant 0 : i32
    %c0_i32_0 = arith.constant 0 : i32
    %c0_i32_1 = arith.constant 0 : i32
    return %c0_i32, %c0_i32_0 : i32, i32
  }
  func.func @transform_7(%arg0: i32) -> (i32, i32) {
    %c0_i32 = arith.constant 0 : i32
    %c0_i32_0 = arith.constant 0 : i32
    return %arg0, %c0_i32 : i32, i32
  }
}

module attributes {stable_mosaic.version = 11 : i64} {
  func.func @gaussian_mlp_kernel(%arg0: i32, %arg1: memref<8x128xbf16, #tpu.memory_space<vmem>>, %arg2: memref<128x128xbf16, #tpu.memory_space<vmem>>, %arg3: memref<8x128xf32, #tpu.memory_space<vmem>>, %arg4: memref<128x128xbf16, #tpu.memory_space<vmem>>, %arg5: memref<8x128xf32, #tpu.memory_space<vmem>>, %arg6: memref<128x128xbf16, #tpu.memory_space<vmem>>, %arg7: memref<1x128xf32, #tpu.memory_space<vmem>>, %arg8: memref<8x128xf32, #tpu.memory_space<vmem>>) attributes {dimension_semantics = [#tpu.dimension_semantics<parallel>], iteration_bounds = array<i64: 1>, scalar_prefetch = 0 : i64, scratch_operands = 0 : i64, tpu.core_type = #tpu.core_type<tc>, window_params = [{transform_indices = @transform_0, window_bounds = array<i64: 8, 128>}, {pipeline_mode = #tpu.pipeline_mode<synchronous>, transform_indices = @transform_1, window_bounds = array<i64: 128, 128>}, {pipeline_mode = #tpu.pipeline_mode<synchronous>, transform_indices = @transform_2, window_bounds = array<i64: 8, 128>}, {pipeline_mode = #tpu.pipeline_mode<synchronous>, transform_indices = @transform_3, window_bounds = array<i64: 128, 128>}, {pipeline_mode = #tpu.pipeline_mode<synchronous>, transform_indices = @transform_4, window_bounds = array<i64: 8, 128>}, {pipeline_mode = #tpu.pipeline_mode<synchronous>, transform_indices = @transform_5, window_bounds = array<i64: 128, 128>}, {pipeline_mode = #tpu.pipeline_mode<synchronous>, transform_indices = @transform_6, window_bounds = array<i64: 1, 128>}, {transform_indices = @transform_7, window_bounds = array<i64: 8, 128>}]} {
    %c0 = arith.constant 0 : index
    %c0_0 = arith.constant 0 : index
    %0 = vector.load %arg1[%c0, %c0_0] : memref<8x128xbf16, #tpu.memory_space<vmem>>, vector<8x128xbf16>
    %c0_1 = arith.constant 0 : index
    %c0_2 = arith.constant 0 : index
    %1 = vector.load %arg2[%c0_1, %c0_2] : memref<128x128xbf16, #tpu.memory_space<vmem>>, vector<128x128xbf16>
    %cst = arith.constant dense<0.000000e+00> : vector<8x128xf32>
    %2 = tpu.matmul %0, %1, %cst {dimension_numbers = #tpu.dot_dimension_numbers<[1], [0], [0], [1], [0, 0, 1, 1], [], []>} : vector<8x128xbf16>, vector<128x128xbf16>, vector<8x128xf32> -> vector<8x128xf32>
    %c0_3 = arith.constant 0 : index
    %c0_4 = arith.constant 0 : index
    %3 = vector.load %arg3[%c0_3, %c0_4] : memref<8x128xf32, #tpu.memory_space<vmem>>, vector<1x128xf32>
    %4 = vector.broadcast %3 : vector<1x128xf32> to vector<8x128xf32>
    %5 = arith.addf %2, %4 : vector<8x128xf32>
    %cst_5 = arith.constant 0.000000e+00 : f32
    %6 = vector.broadcast %cst_5 : f32 to vector<8x128xf32>
    %7 = arith.maximumf %5, %6 : vector<8x128xf32>
    %cst_6 = arith.constant dense<0.000000e+00> : vector<8xf32>
    %8 = vector.multi_reduction <add>, %7, %cst_6 [1] : vector<8x128xf32> to vector<8xf32>
    %9 = vector.shape_cast %8 : vector<8xf32> to vector<8x1xf32>
    %cst_7 = arith.constant 3.125000e-02 : f32
    %10 = vector.broadcast %cst_7 : f32 to vector<8x1xf32>
    %11 = arith.mulf %9, %10 : vector<8x1xf32>
    %12 = arith.mulf %7, %7 : vector<8x128xf32>
    %cst_8 = arith.constant dense<0.000000e+00> : vector<8xf32>
    %13 = vector.multi_reduction <add>, %12, %cst_8 [1] : vector<8x128xf32> to vector<8xf32>
    %14 = vector.shape_cast %13 : vector<8xf32> to vector<8x1xf32>
    %cst_9 = arith.constant 3.125000e-02 : f32
    %15 = vector.broadcast %cst_9 : f32 to vector<8x1xf32>
    %16 = arith.mulf %14, %15 : vector<8x1xf32>
    %17 = arith.mulf %11, %11 : vector<8x1xf32>
    %18 = arith.subf %16, %17 : vector<8x1xf32>
    %cst_10 = arith.constant 0.000000e+00 : f32
    %19 = vector.broadcast %cst_10 : f32 to vector<8x1xf32>
    %20 = arith.maximumf %18, %19 : vector<8x1xf32>
    %21 = vector.broadcast %11 : vector<8x1xf32> to vector<8x128xf32>
    %22 = arith.subf %7, %21 : vector<8x128xf32>
    %cst_11 = arith.constant 9.99999974E-6 : f32
    %23 = vector.broadcast %cst_11 : f32 to vector<8x1xf32>
    %24 = arith.addf %20, %23 : vector<8x1xf32>
    %25 = math.rsqrt %24 : vector<8x1xf32>
    %26 = vector.broadcast %25 : vector<8x1xf32> to vector<8x128xf32>
    %27 = arith.mulf %22, %26 : vector<8x128xf32>
    %c1 = arith.constant 1 : index
    %c0_12 = arith.constant 0 : index
    %28 = vector.load %arg3[%c1, %c0_12] : memref<8x128xf32, #tpu.memory_space<vmem>>, vector<1x128xf32>
    %29 = vector.broadcast %28 : vector<1x128xf32> to vector<8x128xf32>
    %30 = arith.mulf %27, %29 : vector<8x128xf32>
    %c2 = arith.constant 2 : index
    %c0_13 = arith.constant 0 : index
    %31 = vector.load %arg3[%c2, %c0_13] : memref<8x128xf32, #tpu.memory_space<vmem>>, vector<1x128xf32>
    %32 = vector.broadcast %31 : vector<1x128xf32> to vector<8x128xf32>
    %33 = arith.addf %30, %32 : vector<8x128xf32>
    %34 = arith.truncf %33 : vector<8x128xf32> to vector<8x128xbf16>
    %c0_14 = arith.constant 0 : index
    %c0_15 = arith.constant 0 : index
    %35 = vector.load %arg4[%c0_14, %c0_15] : memref<128x128xbf16, #tpu.memory_space<vmem>>, vector<128x128xbf16>
    %cst_16 = arith.constant dense<0.000000e+00> : vector<8x128xf32>
    %36 = tpu.matmul %34, %35, %cst_16 {dimension_numbers = #tpu.dot_dimension_numbers<[1], [0], [0], [1], [0, 0, 1, 1], [], []>} : vector<8x128xbf16>, vector<128x128xbf16>, vector<8x128xf32> -> vector<8x128xf32>
    %c0_17 = arith.constant 0 : index
    %c0_18 = arith.constant 0 : index
    %37 = vector.load %arg5[%c0_17, %c0_18] : memref<8x128xf32, #tpu.memory_space<vmem>>, vector<1x128xf32>
    %38 = vector.broadcast %37 : vector<1x128xf32> to vector<8x128xf32>
    %39 = arith.addf %36, %38 : vector<8x128xf32>
    %cst_19 = arith.constant 0.000000e+00 : f32
    %40 = vector.broadcast %cst_19 : f32 to vector<8x128xf32>
    %41 = arith.maximumf %39, %40 : vector<8x128xf32>
    %cst_20 = arith.constant dense<0.000000e+00> : vector<8xf32>
    %42 = vector.multi_reduction <add>, %41, %cst_20 [1] : vector<8x128xf32> to vector<8xf32>
    %43 = vector.shape_cast %42 : vector<8xf32> to vector<8x1xf32>
    %cst_21 = arith.constant 1.562500e-02 : f32
    %44 = vector.broadcast %cst_21 : f32 to vector<8x1xf32>
    %45 = arith.mulf %43, %44 : vector<8x1xf32>
    %46 = arith.mulf %41, %41 : vector<8x128xf32>
    %cst_22 = arith.constant dense<0.000000e+00> : vector<8xf32>
    %47 = vector.multi_reduction <add>, %46, %cst_22 [1] : vector<8x128xf32> to vector<8xf32>
    %48 = vector.shape_cast %47 : vector<8xf32> to vector<8x1xf32>
    %cst_23 = arith.constant 1.562500e-02 : f32
    %49 = vector.broadcast %cst_23 : f32 to vector<8x1xf32>
    %50 = arith.mulf %48, %49 : vector<8x1xf32>
    %51 = arith.mulf %45, %45 : vector<8x1xf32>
    %52 = arith.subf %50, %51 : vector<8x1xf32>
    %cst_24 = arith.constant 0.000000e+00 : f32
    %53 = vector.broadcast %cst_24 : f32 to vector<8x1xf32>
    %54 = arith.maximumf %52, %53 : vector<8x1xf32>
    %55 = vector.broadcast %45 : vector<8x1xf32> to vector<8x128xf32>
    %56 = arith.subf %41, %55 : vector<8x128xf32>
    %cst_25 = arith.constant 9.99999974E-6 : f32
    %57 = vector.broadcast %cst_25 : f32 to vector<8x1xf32>
    %58 = arith.addf %54, %57 : vector<8x1xf32>
    %59 = math.rsqrt %58 : vector<8x1xf32>
    %60 = vector.broadcast %59 : vector<8x1xf32> to vector<8x128xf32>
    %61 = arith.mulf %56, %60 : vector<8x128xf32>
    %c1_26 = arith.constant 1 : index
    %c0_27 = arith.constant 0 : index
    %62 = vector.load %arg5[%c1_26, %c0_27] : memref<8x128xf32, #tpu.memory_space<vmem>>, vector<1x128xf32>
    %63 = vector.broadcast %62 : vector<1x128xf32> to vector<8x128xf32>
    %64 = arith.mulf %61, %63 : vector<8x128xf32>
    %c2_28 = arith.constant 2 : index
    %c0_29 = arith.constant 0 : index
    %65 = vector.load %arg5[%c2_28, %c0_29] : memref<8x128xf32, #tpu.memory_space<vmem>>, vector<1x128xf32>
    %66 = vector.broadcast %65 : vector<1x128xf32> to vector<8x128xf32>
    %67 = arith.addf %64, %66 : vector<8x128xf32>
    %68 = arith.truncf %67 : vector<8x128xf32> to vector<8x128xbf16>
    %c0_30 = arith.constant 0 : index
    %c0_31 = arith.constant 0 : index
    %69 = vector.load %arg6[%c0_30, %c0_31] : memref<128x128xbf16, #tpu.memory_space<vmem>>, vector<128x128xbf16>
    %cst_32 = arith.constant dense<0.000000e+00> : vector<8x128xf32>
    %70 = tpu.matmul %68, %69, %cst_32 {dimension_numbers = #tpu.dot_dimension_numbers<[1], [0], [0], [1], [0, 0, 1, 1], [], []>} : vector<8x128xbf16>, vector<128x128xbf16>, vector<8x128xf32> -> vector<8x128xf32>
    %c0_33 = arith.constant 0 : index
    %c0_34 = arith.constant 0 : index
    %71 = vector.load %arg7[%c0_33, %c0_34] : memref<1x128xf32, #tpu.memory_space<vmem>>, vector<1x128xf32>
    %72 = vector.broadcast %71 : vector<1x128xf32> to vector<8x128xf32>
    %73 = arith.addf %70, %72 : vector<8x128xf32>
    %c0_35 = arith.constant 0 : index
    %c0_36 = arith.constant 0 : index
    %74 = vector.load %arg8[%c0_35, %c0_36] : memref<8x128xf32, #tpu.memory_space<vmem>>, vector<8x128xf32>
    tpu.vector_store %arg8[%c0_35, %c0_36], %73 {strides = array<i32>} : memref<8x128xf32, #tpu.memory_space<vmem>>, vector<8x128xf32>,
    return
  }
  func.func @transform_0(%arg0: i32) -> (i32, i32) {
    %c0_i32 = arith.constant 0 : i32
    %c0_i32_0 = arith.constant 0 : i32
    return %arg0, %c0_i32 : i32, i32
  }
  func.func @transform_1(%arg0: i32) -> (i32, i32) {
    %c0_i32 = arith.constant 0 : i32
    %c0_i32_0 = arith.constant 0 : i32
    %c0_i32_1 = arith.constant 0 : i32
    return %c0_i32, %c0_i32_0 : i32, i32
  }
  func.func @transform_2(%arg0: i32) -> (i32, i32) {
    %c0_i32 = arith.constant 0 : i32
    %c0_i32_0 = arith.constant 0 : i32
    %c0_i32_1 = arith.constant 0 : i32
    return %c0_i32, %c0_i32_0 : i32, i32
  }
  func.func @transform_3(%arg0: i32) -> (i32, i32) {
    %c0_i32 = arith.constant 0 : i32
    %c0_i32_0 = arith.constant 0 : i32
    %c0_i32_1 = arith.constant 0 : i32
    return %c0_i32, %c0_i32_0 : i32, i32
  }
  func.func @transform_4(%arg0: i32) -> (i32, i32) {
    %c0_i32 = arith.constant 0 : i32
    %c0_i32_0 = arith.constant 0 : i32
    %c0_i32_1 = arith.constant 0 : i32
    return %c0_i32, %c0_i32_0 : i32, i32
  }
  func.func @transform_5(%arg0: i32) -> (i32, i32) {
    %c0_i32 = arith.constant 0 : i32
    %c0_i32_0 = arith.constant 0 : i32
    %c0_i32_1 = arith.constant 0 : i32
    return %c0_i32, %c0_i32_0 : i32, i32
  }
  func.func @transform_6(%arg0: i32) -> (i32, i32) {
    %c0_i32 = arith.constant 0 : i32
    %c0_i32_0 = arith.constant 0 : i32
    %c0_i32_1 = arith.constant 0 : i32
    return %c0_i32, %c0_i32_0 : i32, i32
  }
  func.func @transform_7(%arg0: i32) -> (i32, i32) {
    %c0_i32 = arith.constant 0 : i32
    %c0_i32_0 = arith.constant 0 : i32
    return %arg0, %c0_i32 : i32, i32
  }
}

</mosaic_0001>

<bundles_post_ra>
// kernel: tpu_custom_call.1
= control target key start
LH: loop header
LB: loop body
LE: loop exit
PB: predicated region body
PF: predicated region fallthrough
CT: control target
= control target key end

     0   :  { %12 = vsyncpa [#allocation3], 0  ;;  %s965_s0 = inlined_call_operand.hbm [shape: bf16[8,128], index: 0, kind: input, shape index: {}]   ;;  %s966_s1 = inlined_call_operand.hbm [shape: bf16[128,128], index: 1, kind: input, shape index: {}]   ;;  %s967_s2 = inlined_call_operand.hbm [shape: f32[8,128], index: 2, kind: input, shape index: {}]   ;;  %s968_s3 = inlined_call_operand.hbm [shape: bf16[128,128], index: 3, kind: input, shape index: {}]   ;;  %s969_s4 = inlined_call_operand.vmem [shape: f32[8,128], index: 4, kind: input, shape index: {}]   ;;  %s970_s5 = inlined_call_operand.hbm [shape: bf16[128,128], index: 5, kind: input, shape index: {}]   ;;  %s971_s6 = inlined_call_operand.vmem [shape: f32[1,128], index: 6, kind: input, shape index: {}]   ;;  %s972_s7 = inlined_call_operand.hbm [shape: f32[8,128], index: 7, kind: output, shape index: {}]  }
   0x1   :  { %13 = vsyncpa [#allocation6], 0 }
   0x2   :  { %14 = vsyncpa [#allocation9], 0 }
   0x3   :  { %15 = vsyncpa [#allocation4], 0  ;;  %s792_s24 = smov [#allocation5]   ;;  %s652_s28 = scalar_lea.hbm %s966_s1, 1024 }
   0x4   :  { %s31_s25 = sshll.u32 %s792_s24, 4  ;;  %p653_p0 = scmp.ne.s32.totalorder %s966_s1, %s652_s28  ;;  %s32_s25 = int_to_ptr.vmem [resolvable:$true] %s31_s25 }
   0x5   :  { %p656_p1 = scmp.lt.u32.totalorder %s652_s28, %s966_s1 }
   0x7   :  { %p658_p2 = pnand %p656_p1, %p653_p0 }
   0x9   :  { %661 = shalt.err (!%p658_p2)
}
   0xa   :  { %s662_s10 = scalar_lea.vmem %s32_s25, 1024  ;;  %p667_p4 = scmp.lt.s32.totalorder %s32_s25, %s32_s25 }
   0xb   :  { %p663_p3 = scmp.ne.s32.totalorder %s32_s25, %s662_s10  ;;  %p668_p5 = scmp.lt.s32.totalorder %s662_s10, %s662_s10 }
   0xd   :  { %p669_p6 = por %p668_p5, %p667_p4 }
   0xf   :  { %p670_p7 = pnand %p669_p6, %p663_p3 }
  0x11   :  { %673 = shalt.err (!%p670_p7)
}
  0x12   :  { %s793_s11 = smov 64   ;;  %s794_s12 = smov 4  }
  0x13   :  { %37 = dma.hbm_to_vmem [thread:$0]  %s966_s1, 1024, %s32_s25, [#allocation6], %s793_s11, %s793_s11, %s794_s12  }
  0x14   :  { %s795_s15 = smov [#allocation8]   ;;  %s796_s17 = smov [#allocation2]  }
  0x15   :  { %s53_s16 = sshll.u32 %s795_s15, 4  ;;  %s22_s18 = sshll.u32 %s796_s17, 4  ;;  %s54_s16 = int_to_ptr.vmem [resolvable:$true] %s53_s16  ;;  %s23_s18 = int_to_ptr.vmem [resolvable:$true] %s22_s18 }
  0x16   :  { %s674_s21 = scalar_lea.hbm %s968_s3, 1024 }
  0x17   :  { %p675_p8 = scmp.ne.s32.totalorder %s968_s3, %s674_s21  ;;  %p678_p9 = scmp.lt.u32.totalorder %s674_s21, %s968_s3 }
  0x19   :  { %p680_p10 = pnand %p678_p9, %p675_p8 }
  0x1b   :  { %683 = shalt.err (!%p680_p10)
}
  0x1c   :  { %s684_s1 = scalar_lea.vmem %s54_s16, 1024  ;;  %p689_p12 = scmp.lt.s32.totalorder %s54_s16, %s54_s16 }
  0x1d   :  { %p685_p11 = scmp.ne.s32.totalorder %s54_s16, %s684_s1  ;;  %p690_p13 = scmp.lt.s32.totalorder %s684_s1, %s684_s1 }
  0x1f   :  { %p691_p0 = por %p690_p13, %p689_p12 }
  0x21   :  { %p692_p1 = pnand %p691_p0, %p685_p11 }
  0x23   :  { %695 = shalt.err (!%p692_p1)
}
  0x24   :  { %59 = dma.hbm_to_vmem [thread:$0]  %s968_s3, 1024, %s54_s16, [#allocation9], %s793_s11, %s793_s11, %s794_s12  }
  0x25   :  { %s696_s30 = scalar_lea.hbm %s965_s0, 64 }
  0x26   :  { %p697_p2 = scmp.ne.s32.totalorder %s965_s0, %s696_s30  ;;  %p700_p3 = scmp.lt.u32.totalorder %s696_s30, %s965_s0 }
  0x28   :  { %p702_p4 = pnand %p700_p3, %p697_p2 }
  0x2a   :  { %705 = shalt.err (!%p702_p4)
}
  0x2b   :  { %s706_s14 = scalar_lea.vmem %s23_s18, 64  ;;  %p711_p6 = scmp.lt.s32.totalorder %s23_s18, %s23_s18 }
  0x2c   :  { %p707_p5 = scmp.ne.s32.totalorder %s23_s18, %s706_s14  ;;  %p712_p7 = scmp.lt.s32.totalorder %s706_s14, %s706_s14 }
  0x2e   :  { %p713_p8 = por %p712_p7, %p711_p6 }
  0x30   :  { %p714_p9 = pnand %p713_p8, %p707_p5 }
  0x32   :  { %717 = shalt.err (!%p714_p9)
}
  0x33   :  { %25 = dma.hbm_to_vmem [thread:$0]  %s965_s0, 64, %s23_s18, [#allocation3]  }
  0x34   :  { %s797_s16 = smov [#allocation7]   ;;  %s798_s19 = smov [#allocation10]  }
  0x35   :  { %s44_s17 = sshll.u32 %s797_s16, 4  ;;  %s67_s20 = sshll.u32 %s798_s19, 4  ;;  %s45_s17 = int_to_ptr.vmem [resolvable:$true] %s44_s17  ;;  %s68_s20 = int_to_ptr.vmem [resolvable:$true] %s67_s20 }
  0x36   :  { %s718_s23 = scalar_lea.hbm %s967_s2, 128 }
  0x37   :  { %p719_p10 = scmp.ne.s32.totalorder %s967_s2, %s718_s23  ;;  %p722_p11 = scmp.lt.u32.totalorder %s718_s23, %s967_s2 }
  0x39   :  { %p724_p12 = pnand %p722_p11, %p719_p10 }
  0x3b   :  { %727 = shalt.err (!%p724_p12)
}
  0x3c   :  { %s728_s0 = scalar_lea.vmem %s45_s17, 128  ;;  %p733_p0 = scmp.lt.s32.totalorder %s45_s17, %s45_s17 }
  0x3d   :  { %p729_p13 = scmp.ne.s32.totalorder %s45_s17, %s728_s0  ;;  %p734_p1 = scmp.lt.s32.totalorder %s728_s0, %s728_s0 }
  0x3f   :  { %p735_p2 = por %p734_p1, %p733_p0 }
  0x41   :  { %p736_p3 = pnand %p735_p2, %p729_p13 }
  0x43   :  { %739 = shalt.err (!%p736_p3)
}
  0x44   :  { %47 = dma.hbm_to_vmem [thread:$0]  %s967_s2, 128, %s45_s17, [#allocation6]  }
  0x45   :  { %s740_s30 = scalar_lea.hbm %s970_s5, 1024 }
  0x46   :  { %p741_p4 = scmp.ne.s32.totalorder %s970_s5, %s740_s30  ;;  %p744_p5 = scmp.lt.u32.totalorder %s740_s30, %s970_s5 }
  0x48   :  { %p746_p6 = pnand %p744_p5, %p741_p4 }
  0x4a   :  { %749 = shalt.err (!%p746_p6)
}
  0x4b   :  { %s750_s14 = scalar_lea.vmem %s68_s20, 1024  ;;  %p755_p8 = scmp.lt.s32.totalorder %s68_s20, %s68_s20 }
  0x4c   :  { %p751_p7 = scmp.ne.s32.totalorder %s68_s20, %s750_s14  ;;  %p756_p9 = scmp.lt.s32.totalorder %s750_s14, %s750_s14 }
  0x4e   :  { %p757_p10 = por %p756_p9, %p755_p8 }
  0x50   :  { %p758_p11 = pnand %p757_p10, %p751_p7 }
  0x52   :  { %761 = shalt.err (!%p758_p11)
}
  0x53   :  { %73 = dma.hbm_to_vmem [thread:$0]  %s970_s5, 1024, %s68_s20, [#allocation9], %s793_s11, %s793_s11, %s794_s12  }
  0x54   :  { %784 = dma.done.wait [#allocation3], 64  }
  0x55   :  { %785 = vsyncadd [#allocation3], 4294967232 }
  0x56   :  { %786 = dma.done.wait [#allocation6], 1152  }
  0x57   :  { %787 = vsyncadd [#allocation6], 4294966144 }
  0x58   :  { %788 = dma.done.wait [#allocation9], 2048  }
  0x59   :  { %789 = vsyncadd [#allocation9], 4294965248  ;;  %v799_v0 = vmov 0.0   ;;  %vm800_vm0 = vmmov 0   ;;  %v624_v1 = vld [vmem:[#allocation5] sm:$0xff]   ;;  %v625_v2 = vld [vmem:[#allocation5 + $0x8] sm:$0xff]  }
  0x5a   :  { %554 = vmatprep.subr.bf16.mxu0 %v799_v0  ;;  %570 = vmatprep.mubr.msk.bf16.mxu0 %vm800_vm0, %v799_v0  ;;  %v626_v3 = vld [vmem:[#allocation5 + $0x10] sm:$0xff]   ;;  %v627_v4 = vld [vmem:[#allocation5 + $0x18] sm:$0xff]   ;;  %v628_v5 = vld [vmem:[#allocation5 + $0x20] sm:$0xff]   ;;  %s801_s21 = smov [#allocation11]  }
  0x5b   :  { %574 = vmatprep.subr.bf16.mxu1 %v799_v0  ;;  %590 = vmatprep.mubr.msk.bf16.mxu1 %vm800_vm0, %v799_v0  ;;  %v629_v6 = vld [vmem:[#allocation5 + $0x28] sm:$0xff]   ;;  %v630_v7 = vld [vmem:[#allocation5 + $0x30] sm:$0xff]   ;;  %v631_v8 = vld [vmem:[#allocation5 + $0x38] sm:$0xff]   ;;  %s485_s22 = sshll.u32 %s801_s21, 4  ;;  %s486_s22 = int_to_ptr.vmem [resolvable:$true] %s485_s22 }
  0x5c   :  { %555 = vmatpush3.bf16.msra.mxu0 %v624_v1  ;;  %v92_v9 = vld [vmem:[#allocation2] sm:$0xf]  ;;  %v496_v10 = vld [vmem:[#allocation7] ss:$0 sm:$0xff]  ;;  %v632_v18 = vld [vmem:[#allocation8] sm:$0xff]   ;;  %s762_s23 = scalar_lea.vmem %s486_s22, 128  ;;  %p767_p13 = scmp.lt.s32.totalorder %s486_s22, %s486_s22 }
  0x5d   :  { %556 = vmatprep.subr.bf16.mxu0 %v799_v0  ;;  %575 = vmatpush3.bf16.msra.mxu1 %v632_v18  ;;  %v633_v19 = vld [vmem:[#allocation8 + $0x8] sm:$0xff]   ;;  %v634_v20 = vld [vmem:[#allocation8 + $0x10] sm:$0xff]   ;;  %v635_v21 = vld [vmem:[#allocation8 + $0x18] sm:$0xff]   ;;  %p763_p12 = scmp.ne.s32.totalorder %s486_s22, %s762_s23  ;;  %p768_p0 = scmp.lt.s32.totalorder %s762_s23, %s762_s23 }
  0x5e   :  { %576 = vmatprep.subr.bf16.mxu1 %v799_v0  ;;  %v636_v22 = vld [vmem:[#allocation8 + $0x20] sm:$0xff]   ;;  %v637_v23 = vld [vmem:[#allocation8 + $0x28] sm:$0xff]   ;;  %v638_v24 = vld [vmem:[#allocation8 + $0x30] sm:$0xff]  }
  0x5f   :  { %v639_v25 = vld [vmem:[#allocation8 + $0x38] sm:$0xff]   ;;  %v507_v42 = vld [vmem:[%s969_s4] ss:$0 sm:$0xff]  ;;  %v640_v50 = vld [vmem:[#allocation10] sm:$0xff]   ;;  %p769_p1 = por %p768_p0, %p767_p13 }
  0x60   :  { %557 = vmatpush3.bf16.msra.mxu0 %v625_v2  ;;  %v505_v36 = vld [vmem:[#allocation7 + $0x1] ss:$0 sm:$0xff]  ;;  %v506_v38 = vld [vmem:[#allocation7 + $0x2] ss:$0 sm:$0xff]  ;;  %v641_v51 = vld [vmem:[#allocation10 + $0x8] sm:$0xff]  }
  0x61   :  { %558 = vmatprep.subr.bf16.mxu0 %v799_v0  ;;  %577 = vmatpush3.bf16.msra.mxu1 %v633_v19  ;;  %v642_v52 = vld [vmem:[#allocation10 + $0x10] sm:$0xff]   ;;  %v643_v53 = vld [vmem:[#allocation10 + $0x18] sm:$0xff]   ;;  %v644_v54 = vld [vmem:[#allocation10 + $0x20] sm:$0xff]   ;;  %p770_p2 = pnand %p769_p1, %p763_p12 }
  0x62   :  { %578 = vmatprep.subr.bf16.mxu1 %v799_v0  ;;  %v645_v55 = vld [vmem:[#allocation10 + $0x28] sm:$0xff]   ;;  %v646_v56 = vld [vmem:[#allocation10 + $0x30] sm:$0xff]   ;;  %v647_v57 = vld [vmem:[#allocation10 + $0x38] sm:$0xff]  }
  0x64   :  { %559 = vmatpush3.bf16.msra.mxu0 %v626_v3 }
  0x65   :  { %560 = vmatprep.subr.bf16.mxu0 %v799_v0  ;;  %579 = vmatpush3.bf16.msra.mxu1 %v634_v20 }
  0x66   :  { %580 = vmatprep.subr.bf16.mxu1 %v799_v0 }
  0x68   :  { %561 = vmatpush3.bf16.msra.mxu0 %v627_v4 }
  0x69   :  { %562 = vmatprep.subr.bf16.mxu0 %v799_v0  ;;  %581 = vmatpush3.bf16.msra.mxu1 %v635_v21 }
  0x6a   :  { %582 = vmatprep.subr.bf16.mxu1 %v799_v0 }
  0x6c   :  { %563 = vmatpush3.bf16.msra.mxu0 %v628_v5  ;;  %v516_v5 = vld [vmem:[%s969_s4 + $0x1] ss:$0 sm:$0xff] }
  0x6d   :  { %564 = vmatprep.subr.bf16.mxu0 %v799_v0  ;;  %583 = vmatpush3.bf16.msra.mxu1 %v636_v22 }
  0x6e   :  { %584 = vmatprep.subr.bf16.mxu1 %v799_v0 }
  0x70   :  { %565 = vmatpush3.bf16.msra.mxu0 %v629_v6 }
  0x71   :  { %566 = vmatprep.subr.bf16.mxu0 %v799_v0  ;;  %585 = vmatpush3.bf16.msra.mxu1 %v637_v23 }
  0x72   :  { %586 = vmatprep.subr.bf16.mxu1 %v799_v0 }
  0x74   :  { %567 = vmatpush3.bf16.msra.mxu0 %v630_v7 }
  0x75   :  { %568 = vmatprep.subr.bf16.mxu0 %v799_v0  ;;  %587 = vmatpush3.bf16.msra.mxu1 %v638_v24 }
  0x76   :  { %588 = vmatprep.subr.bf16.mxu1 %v799_v0 }
  0x78   :  { %569 = vmatpush3.bf16.msra.mxu0 %v631_v8 }
  0x79   :  { %594 = vmatprep.subr.bf16.mxu0 %v799_v0  ;;  %589 = vmatpush3.bf16.msra.mxu1 %v639_v25 }
  0x7b   :  { %571 = vmatmul.mubr.bf16.vlgmr.msra.gmra.mrb[0].mxu0 %v92_v9 }
  0x7c   :  { %610 = vmatprep.mubr.msk.bf16.mxu0 %vm800_vm0, %v799_v0  ;;  %595 = vmatpush3.bf16.msra.mxu0 %v640_v50 }
  0x7d   :  { %596 = vmatprep.subr.bf16.mxu0 %v799_v0 }
  0x80   :  { %597 = vmatpush3.bf16.msra.mxu0 %v641_v51 }
  0x81   :  { %598 = vmatprep.subr.bf16.mxu0 %v799_v0 }
  0x84   :  { %599 = vmatpush3.bf16.msra.mxu0 %v642_v52 }
  0x85   :  { %600 = vmatprep.subr.bf16.mxu0 %v799_v0 }
  0x88   :  { %601 = vmatpush3.bf16.msra.mxu0 %v643_v53 }
  0x89   :  { %602 = vmatprep.subr.bf16.mxu0 %v799_v0 }
  0x8c   :  { %603 = vmatpush3.bf16.msra.mxu0 %v644_v54 }
  0x8d   :  { %604 = vmatprep.subr.bf16.mxu0 %v799_v0 }
  0x90   :  { %605 = vmatpush3.bf16.msra.mxu0 %v645_v55 }
  0x91   :  { %606 = vmatprep.subr.bf16.mxu0 %v799_v0 }
  0x94   :  { %607 = vmatpush3.bf16.msra.mxu0 %v646_v56 }
  0x95   :  { %608 = vmatprep.subr.bf16.mxu0 %v799_v0  ;;  %v517_v0 = vld [vmem:[%s969_s4 + $0x2] ss:$0 sm:$0xff] }
  0x98   :  { %609 = vmatpush3.bf16.msra.mxu0 %v647_v57 }
 0x14e   :  { %v196_v11 = vpop.f32.mrb[0].mxu0 }
 0x14f   :  { %v197_v12 = vadd.f32 %v496_v10, %v196_v11  ;;  %v572_v13 = vpop.f32.mrb[1].mxu0  ;;  %v518_v10 = vld [vmem:[%s971_s6] ss:$0 sm:$0xff] }
 0x150   :  { %v199_v14 = vpop.f32.mrb[2].mxu0 }
 0x151   :  { %v202_v15 = vmax.f32 %v197_v12, 0.0  ;;  %v573_v16 = vpop.f32.mrb[3].mxu0 }
 0x153   :  { %203 = vadd.xlane.f32.xlu0 %v202_v15  ;;  %v206_v17 = vmul.f32 %v202_v15, %v202_v15 }
 0x157   :  { %207 = vadd.xlane.f32.xlu0 %v206_v17 }
 0x1e0   :  { %v204_v26 = vpop.xlane.xlu0 %203 }
 0x1e1   :  { %v205_v27 = vmul.f32 0.03125, %v204_v26 }
 0x1e3   :  { %v210_v29 = vmul.f32 %v205_v27, %v205_v27  ;;  %v213_v34 = vsub.f32 %v202_v15, %v205_v27 }
 0x1e4   :  { %v208_v28 = vpop.xlane.xlu0 %207 }
 0x1e5   :  { %v209_v30 = vmul.f32 0.03125, %v208_v28 }
 0x1e7   :  { %v211_v31 = vsub.f32 %v209_v30, %v210_v29 }
 0x1e9   :  { %v212_v32 = vmax.f32 %v211_v31, 0.0 }
 0x1eb   :  { %v214_v33 = vadd.f32 1e-05, %v212_v32 }
 0x1ed   :  { %648 = vrsqrt.f32 %v214_v33 }
 0x1f7   :  { %v649_v35 = vpop.eup %648 }
 0x1f8   :  { %v216_v37 = vmul.f32 %v649_v35, %v213_v34 }
 0x1fa   :  { %v222_v39 = vmul.f32 %v505_v36, %v216_v37 }
 0x1fc   :  { %v228_v40 = vadd.f32 %v506_v38, %v222_v39 }
 0x1fe   :  { %v229_v41 = vpack.c.bf16 %v228_v40, %v228_v40 }
 0x200   :  { %591 = vmatmul.mubr.bf16.vlgmr.msra.gmra.mrb[0].mxu1 %v229_v41 }
 0x2d3   :  { %v333_v43 = vpop.f32.mrb[0].mxu1 }
 0x2d4   :  { %v334_v44 = vadd.f32 %v507_v42, %v333_v43  ;;  %v592_v45 = vpop.f32.mrb[1].mxu1 }
 0x2d5   :  { %v336_v46 = vpop.f32.mrb[2].mxu1 }
 0x2d6   :  { %v339_v47 = vmax.f32 %v334_v44, 0.0  ;;  %v593_v48 = vpop.f32.mrb[3].mxu1 }
 0x2d8   :  { %340 = vadd.xlane.f32.xlu1 %v339_v47  ;;  %v343_v49 = vmul.f32 %v339_v47, %v339_v47 }
 0x2dc   :  { %344 = vadd.xlane.f32.xlu1 %v343_v49 }
 0x365   :  { %v341_v58 = vpop.xlane.xlu1 %340 }
 0x366   :  { %v342_v59 = vmul.f32 0.015625, %v341_v58 }
 0x368   :  { %v347_v61 = vmul.f32 %v342_v59, %v342_v59  ;;  %v350_v3 = vsub.f32 %v339_v47, %v342_v59 }
 0x369   :  { %v345_v60 = vpop.xlane.xlu1 %344 }
 0x36a   :  { %v346_v62 = vmul.f32 0.015625, %v345_v60 }
 0x36c   :  { %v348_v63 = vsub.f32 %v346_v62, %v347_v61 }
 0x36e   :  { %v349_v1 = vmax.f32 %v348_v63, 0.0 }
 0x370   :  { %v351_v2 = vadd.f32 1e-05, %v349_v1 }
 0x372   :  { %650 = vrsqrt.f32 %v351_v2 }
 0x37c   :  { %v651_v4 = vpop.eup %650 }
 0x37d   :  { %v353_v6 = vmul.f32 %v651_v4, %v350_v3 }
 0x37f   :  { %v359_v7 = vmul.f32 %v516_v5, %v353_v6 }
 0x381   :  { %v365_v8 = vadd.f32 %v517_v0, %v359_v7 }
 0x383   :  { %v366_v9 = vpack.c.bf16 %v365_v8, %v365_v8 }
 0x385   :  { %611 = vmatmul.mubr.bf16.vlgmr.msra.gmra.mrb[4].mxu0 %v366_v9 }
 0x458   :  { %v472_v11 = vpop.f32.mrb[4].mxu0 }
 0x459   :  { %v473_v12 = vadd.f32 %v518_v10, %v472_v11  ;;  %v612_v13 = vpop.f32.mrb[5].mxu0 }
 0x45a   :  { %v475_v14 = vpop.f32.mrb[6].mxu0 }
 0x45b   :  { %478 = vst [vmem:[#allocation11] sm:$0xff] %v473_v12  ;;  %v613_v15 = vpop.f32.mrb[7].mxu0 }
 0x45c   :  { %773 = shalt.err (!%p770_p2)
}
 0x45d   :  { %s774_s6 = scalar_lea.hbm %s972_s7, 128 }
 0x45e   :  { %p775_p3 = scmp.ne.s32.totalorder %s972_s7, %s774_s6  ;;  %p778_p4 = scmp.lt.u32.totalorder %s774_s6, %s972_s7 }
 0x460   :  { %p780_p5 = pnand %p778_p4, %p775_p3 }
 0x462   :  { %783 = shalt.err (!%p780_p5)
}
 0x463   :  { %488 = dma.vmem_to_hbm [thread:$0]  %s486_s22, 128, %s972_s7, [#allocation4]  }
 0x464   :  { %790 = dma.done.wait [#allocation4], 128  }
 0x465   :  { %791 = vsyncadd [#allocation4], 4294967168 }
 0x466   :  { %492 = vsyncpa [#allocation3], 1 }
 0x467   :  { %493 = vsyncpa [#allocation6], 1 }
 0x468   :  { %494 = vsyncpa [#allocation9], 1 }
 0x469   :  { %495 = vsyncpa [#allocation4], 1 }

// kernel: tpu_custom_call.1
= control target key start
LH: loop header
LB: loop body
LE: loop exit
PB: predicated region body
PF: predicated region fallthrough
CT: control target
= control target key end

     0   :  { %12 = vsyncpa [#allocation3], 0  ;;  %s965_s0 = inlined_call_operand.hbm [shape: bf16[8,128], index: 0, kind: input, shape index: {}]   ;;  %s966_s1 = inlined_call_operand.hbm [shape: bf16[128,128], index: 1, kind: input, shape index: {}]   ;;  %s967_s2 = inlined_call_operand.hbm [shape: f32[8,128], index: 2, kind: input, shape index: {}]   ;;  %s968_s3 = inlined_call_operand.hbm [shape: bf16[128,128], index: 3, kind: input, shape index: {}]   ;;  %s969_s4 = inlined_call_operand.vmem [shape: f32[8,128], index: 4, kind: input, shape index: {}]   ;;  %s970_s5 = inlined_call_operand.hbm [shape: bf16[128,128], index: 5, kind: input, shape index: {}]   ;;  %s971_s6 = inlined_call_operand.vmem [shape: f32[1,128], index: 6, kind: input, shape index: {}]   ;;  %s972_s7 = inlined_call_operand.hbm [shape: f32[8,128], index: 7, kind: output, shape index: {}]  }
   0x1   :  { %13 = vsyncpa [#allocation6], 0 }
   0x2   :  { %14 = vsyncpa [#allocation9], 0 }
   0x3   :  { %15 = vsyncpa [#allocation4], 0  ;;  %s792_s24 = smov [#allocation5]   ;;  %s652_s28 = scalar_lea.hbm %s966_s1, 1024 }
   0x4   :  { %s31_s25 = sshll.u32 %s792_s24, 4  ;;  %p653_p0 = scmp.ne.s32.totalorder %s966_s1, %s652_s28  ;;  %s32_s25 = int_to_ptr.vmem [resolvable:$true] %s31_s25 }
   0x5   :  { %p656_p1 = scmp.lt.u32.totalorder %s652_s28, %s966_s1 }
   0x7   :  { %p658_p2 = pnand %p656_p1, %p653_p0 }
   0x9   :  { %661 = shalt.err (!%p658_p2)
}
   0xa   :  { %s662_s10 = scalar_lea.vmem %s32_s25, 1024  ;;  %p667_p4 = scmp.lt.s32.totalorder %s32_s25, %s32_s25 }
   0xb   :  { %p663_p3 = scmp.ne.s32.totalorder %s32_s25, %s662_s10  ;;  %p668_p5 = scmp.lt.s32.totalorder %s662_s10, %s662_s10 }
   0xd   :  { %p669_p6 = por %p668_p5, %p667_p4 }
   0xf   :  { %p670_p7 = pnand %p669_p6, %p663_p3 }
  0x11   :  { %673 = shalt.err (!%p670_p7)
}
  0x12   :  { %s793_s11 = smov 64   ;;  %s794_s12 = smov 4  }
  0x13   :  { %37 = dma.hbm_to_vmem [thread:$0]  %s966_s1, 1024, %s32_s25, [#allocation6], %s793_s11, %s793_s11, %s794_s12  }
  0x14   :  { %s795_s15 = smov [#allocation8]   ;;  %s796_s17 = smov [#allocation2]  }
  0x15   :  { %s53_s16 = sshll.u32 %s795_s15, 4  ;;  %s22_s18 = sshll.u32 %s796_s17, 4  ;;  %s54_s16 = int_to_ptr.vmem [resolvable:$true] %s53_s16  ;;  %s23_s18 = int_to_ptr.vmem [resolvable:$true] %s22_s18 }
  0x16   :  { %s674_s21 = scalar_lea.hbm %s968_s3, 1024 }
  0x17   :  { %p675_p8 = scmp.ne.s32.totalorder %s968_s3, %s674_s21  ;;  %p678_p9 = scmp.lt.u32.totalorder %s674_s21, %s968_s3 }
  0x19   :  { %p680_p10 = pnand %p678_p9, %p675_p8 }
  0x1b   :  { %683 = shalt.err (!%p680_p10)
}
  0x1c   :  { %s684_s1 = scalar_lea.vmem %s54_s16, 1024  ;;  %p689_p12 = scmp.lt.s32.totalorder %s54_s16, %s54_s16 }
  0x1d   :  { %p685_p11 = scmp.ne.s32.totalorder %s54_s16, %s684_s1  ;;  %p690_p13 = scmp.lt.s32.totalorder %s684_s1, %s684_s1 }
  0x1f   :  { %p691_p0 = por %p690_p13, %p689_p12 }
  0x21   :  { %p692_p1 = pnand %p691_p0, %p685_p11 }
  0x23   :  { %695 = shalt.err (!%p692_p1)
}
  0x24   :  { %59 = dma.hbm_to_vmem [thread:$0]  %s968_s3, 1024, %s54_s16, [#allocation9], %s793_s11, %s793_s11, %s794_s12  }
  0x25   :  { %s696_s30 = scalar_lea.hbm %s965_s0, 64 }
  0x26   :  { %p697_p2 = scmp.ne.s32.totalorder %s965_s0, %s696_s30  ;;  %p700_p3 = scmp.lt.u32.totalorder %s696_s30, %s965_s0 }
  0x28   :  { %p702_p4 = pnand %p700_p3, %p697_p2 }
  0x2a   :  { %705 = shalt.err (!%p702_p4)
}
  0x2b   :  { %s706_s14 = scalar_lea.vmem %s23_s18, 64  ;;  %p711_p6 = scmp.lt.s32.totalorder %s23_s18, %s23_s18 }
  0x2c   :  { %p707_p5 = scmp.ne.s32.totalorder %s23_s18, %s706_s14  ;;  %p712_p7 = scmp.lt.s32.totalorder %s706_s14, %s706_s14 }
  0x2e   :  { %p713_p8 = por %p712_p7, %p711_p6 }
  0x30   :  { %p714_p9 = pnand %p713_p8, %p707_p5 }
  0x32   :  { %717 = shalt.err (!%p714_p9)
}
  0x33   :  { %25 = dma.hbm_to_vmem [thread:$0]  %s965_s0, 64, %s23_s18, [#allocation3]  }
  0x34   :  { %s797_s16 = smov [#allocation7]   ;;  %s798_s19 = smov [#allocation10]  }
  0x35   :  { %s44_s17 = sshll.u32 %s797_s16, 4  ;;  %s67_s20 = sshll.u32 %s798_s19, 4  ;;  %s45_s17 = int_to_ptr.vmem [resolvable:$true] %s44_s17  ;;  %s68_s20 = int_to_ptr.vmem [resolvable:$true] %s67_s20 }
  0x36   :  { %s718_s23 = scalar_lea.hbm %s967_s2, 128 }
  0x37   :  { %p719_p10 = scmp.ne.s32.totalorder %s967_s2, %s718_s23  ;;  %p722_p11 = scmp.lt.u32.totalorder %s718_s23, %s967_s2 }
  0x39   :  { %p724_p12 = pnand %p722_p11, %p719_p10 }
  0x3b   :  { %727 = shalt.err (!%p724_p12)
}
  0x3c   :  { %s728_s0 = scalar_lea.vmem %s45_s17, 128  ;;  %p733_p0 = scmp.lt.s32.totalorder %s45_s17, %s45_s17 }
  0x3d   :  { %p729_p13 = scmp.ne.s32.totalorder %s45_s17, %s728_s0  ;;  %p734_p1 = scmp.lt.s32.totalorder %s728_s0, %s728_s0 }
  0x3f   :  { %p735_p2 = por %p734_p1, %p733_p0 }
  0x41   :  { %p736_p3 = pnand %p735_p2, %p729_p13 }
  0x43   :  { %739 = shalt.err (!%p736_p3)
}
  0x44   :  { %47 = dma.hbm_to_vmem [thread:$0]  %s967_s2, 128, %s45_s17, [#allocation6]  }
  0x45   :  { %s740_s30 = scalar_lea.hbm %s970_s5, 1024 }
  0x46   :  { %p741_p4 = scmp.ne.s32.totalorder %s970_s5, %s740_s30  ;;  %p744_p5 = scmp.lt.u32.totalorder %s740_s30, %s970_s5 }
  0x48   :  { %p746_p6 = pnand %p744_p5, %p741_p4 }
  0x4a   :  { %749 = shalt.err (!%p746_p6)
}
  0x4b   :  { %s750_s14 = scalar_lea.vmem %s68_s20, 1024  ;;  %p755_p8 = scmp.lt.s32.totalorder %s68_s20, %s68_s20 }
  0x4c   :  { %p751_p7 = scmp.ne.s32.totalorder %s68_s20, %s750_s14  ;;  %p756_p9 = scmp.lt.s32.totalorder %s750_s14, %s750_s14 }
  0x4e   :  { %p757_p10 = por %p756_p9, %p755_p8 }
  0x50   :  { %p758_p11 = pnand %p757_p10, %p751_p7 }
  0x52   :  { %761 = shalt.err (!%p758_p11)
}
  0x53   :  { %73 = dma.hbm_to_vmem [thread:$0]  %s970_s5, 1024, %s68_s20, [#allocation9], %s793_s11, %s793_s11, %s794_s12  }
  0x54   :  { %784 = dma.done.wait [#allocation3], 64  }
  0x55   :  { %785 = vsyncadd [#allocation3], 4294967232 }
  0x56   :  { %786 = dma.done.wait [#allocation6], 1152  }
  0x57   :  { %787 = vsyncadd [#allocation6], 4294966144 }
  0x58   :  { %788 = dma.done.wait [#allocation9], 2048  }
  0x59   :  { %789 = vsyncadd [#allocation9], 4294965248  ;;  %v799_v0 = vmov 0.0   ;;  %vm800_vm0 = vmmov 0   ;;  %v624_v1 = vld [vmem:[#allocation5] sm:$0xff]   ;;  %v625_v2 = vld [vmem:[#allocation5 + $0x8] sm:$0xff]  }
  0x5a   :  { %554 = vmatprep.subr.bf16.mxu0 %v799_v0  ;;  %570 = vmatprep.mubr.msk.bf16.mxu0 %vm800_vm0, %v799_v0  ;;  %v626_v3 = vld [vmem:[#allocation5 + $0x10] sm:$0xff]   ;;  %v627_v4 = vld [vmem:[#allocation5 + $0x18] sm:$0xff]   ;;  %v628_v5 = vld [vmem:[#allocation5 + $0x20] sm:$0xff]   ;;  %s801_s21 = smov [#allocation11]  }
  0x5b   :  { %574 = vmatprep.subr.bf16.mxu1 %v799_v0  ;;  %590 = vmatprep.mubr.msk.bf16.mxu1 %vm800_vm0, %v799_v0  ;;  %v629_v6 = vld [vmem:[#allocation5 + $0x28] sm:$0xff]   ;;  %v630_v7 = vld [vmem:[#allocation5 + $0x30] sm:$0xff]   ;;  %v631_v8 = vld [vmem:[#allocation5 + $0x38] sm:$0xff]   ;;  %s485_s22 = sshll.u32 %s801_s21, 4  ;;  %s486_s22 = int_to_ptr.vmem [resolvable:$true] %s485_s22 }
  0x5c   :  { %555 = vmatpush3.bf16.msra.mxu0 %v624_v1  ;;  %v92_v9 = vld [vmem:[#allocation2] sm:$0xf]  ;;  %v496_v10 = vld [vmem:[#allocation7] ss:$0 sm:$0xff]  ;;  %v632_v18 = vld [vmem:[#allocation8] sm:$0xff]   ;;  %s762_s23 = scalar_lea.vmem %s486_s22, 128  ;;  %p767_p13 = scmp.lt.s32.totalorder %s486_s22, %s486_s22 }
  0x5d   :  { %556 = vmatprep.subr.bf16.mxu0 %v799_v0  ;;  %575 = vmatpush3.bf16.msra.mxu1 %v632_v18  ;;  %v633_v19 = vld [vmem:[#allocation8 + $0x8] sm:$0xff]   ;;  %v634_v20 = vld [vmem:[#allocation8 + $0x10] sm:$0xff]   ;;  %v635_v21 = vld [vmem:[#allocation8 + $0x18] sm:$0xff]   ;;  %p763_p12 = scmp.ne.s32.totalorder %s486_s22, %s762_s23  ;;  %p768_p0 = scmp.lt.s32.totalorder %s762_s23, %s762_s23 }
  0x5e   :  { %576 = vmatprep.subr.bf16.mxu1 %v799_v0  ;;  %v636_v22 = vld [vmem:[#allocation8 + $0x20] sm:$0xff]   ;;  %v637_v23 = vld [vmem:[#allocation8 + $0x28] sm:$0xff]   ;;  %v638_v24 = vld [vmem:[#allocation8 + $0x30] sm:$0xff]  }
  0x5f   :  { %v639_v25 = vld [vmem:[#allocation8 + $0x38] sm:$0xff]   ;;  %v507_v42 = vld [vmem:[%s969_s4] ss:$0 sm:$0xff]  ;;  %v640_v50 = vld [vmem:[#allocation10] sm:$0xff]   ;;  %p769_p1 = por %p768_p0, %p767_p13 }
  0x60   :  { %557 = vmatpush3.bf16.msra.mxu0 %v625_v2  ;;  %v505_v36 = vld [vmem:[#allocation7 + $0x1] ss:$0 sm:$0xff]  ;;  %v506_v38 = vld [vmem:[#allocation7 + $0x2] ss:$0 sm:$0xff]  ;;  %v641_v51 = vld [vmem:[#allocation10 + $0x8] sm:$0xff]  }
  0x61   :  { %558 = vmatprep.subr.bf16.mxu0 %v799_v0  ;;  %577 = vmatpush3.bf16.msra.mxu1 %v633_v19  ;;  %v642_v52 = vld [vmem:[#allocation10 + $0x10] sm:$0xff]   ;;  %v643_v53 = vld [vmem:[#allocation10 + $0x18] sm:$0xff]   ;;  %v644_v54 = vld [vmem:[#allocation10 + $0x20] sm:$0xff]   ;;  %p770_p2 = pnand %p769_p1, %p763_p12 }
  0x62   :  { %578 = vmatprep.subr.bf16.mxu1 %v799_v0  ;;  %v645_v55 = vld [vmem:[#allocation10 + $0x28] sm:$0xff]   ;;  %v646_v56 = vld [vmem:[#allocation10 + $0x30] sm:$0xff]   ;;  %v647_v57 = vld [vmem:[#allocation10 + $0x38] sm:$0xff]  }
  0x64   :  { %559 = vmatpush3.bf16.msra.mxu0 %v626_v3 }
  0x65   :  { %560 = vmatprep.subr.bf16.mxu0 %v799_v0  ;;  %579 = vmatpush3.bf16.msra.mxu1 %v634_v20 }
  0x66   :  { %580 = vmatprep.subr.bf16.mxu1 %v799_v0 }
  0x68   :  { %561 = vmatpush3.bf16.msra.mxu0 %v627_v4 }
  0x69   :  { %562 = vmatprep.subr.bf16.mxu0 %v799_v0  ;;  %581 = vmatpush3.bf16.msra.mxu1 %v635_v21 }
  0x6a   :  { %582 = vmatprep.subr.bf16.mxu1 %v799_v0 }
  0x6c   :  { %563 = vmatpush3.bf16.msra.mxu0 %v628_v5  ;;  %v516_v5 = vld [vmem:[%s969_s4 + $0x1] ss:$0 sm:$0xff] }
  0x6d   :  { %564 = vmatprep.subr.bf16.mxu0 %v799_v0  ;;  %583 = vmatpush3.bf16.msra.mxu1 %v636_v22 }
  0x6e   :  { %584 = vmatprep.subr.bf16.mxu1 %v799_v0 }
  0x70   :  { %565 = vmatpush3.bf16.msra.mxu0 %v629_v6 }
  0x71   :  { %566 = vmatprep.subr.bf16.mxu0 %v799_v0  ;;  %585 = vmatpush3.bf16.msra.mxu1 %v637_v23 }
  0x72   :  { %586 = vmatprep.subr.bf16.mxu1 %v799_v0 }
  0x74   :  { %567 = vmatpush3.bf16.msra.mxu0 %v630_v7 }
  0x75   :  { %568 = vmatprep.subr.bf16.mxu0 %v799_v0  ;;  %587 = vmatpush3.bf16.msra.mxu1 %v638_v24 }
  0x76   :  { %588 = vmatprep.subr.bf16.mxu1 %v799_v0 }
  0x78   :  { %569 = vmatpush3.bf16.msra.mxu0 %v631_v8 }
  0x79   :  { %594 = vmatprep.subr.bf16.mxu0 %v799_v0  ;;  %589 = vmatpush3.bf16.msra.mxu1 %v639_v25 }
  0x7b   :  { %571 = vmatmul.mubr.bf16.vlgmr.msra.gmra.mrb[0].mxu0 %v92_v9 }
  0x7c   :  { %610 = vmatprep.mubr.msk.bf16.mxu0 %vm800_vm0, %v799_v0  ;;  %595 = vmatpush3.bf16.msra.mxu0 %v640_v50 }
  0x7d   :  { %596 = vmatprep.subr.bf16.mxu0 %v799_v0 }
  0x80   :  { %597 = vmatpush3.bf16.msra.mxu0 %v641_v51 }
  0x81   :  { %598 = vmatprep.subr.bf16.mxu0 %v799_v0 }
  0x84   :  { %599 = vmatpush3.bf16.msra.mxu0 %v642_v52 }
  0x85   :  { %600 = vmatprep.subr.bf16.mxu0 %v799_v0 }
  0x88   :  { %601 = vmatpush3.bf16.msra.mxu0 %v643_v53 }
  0x89   :  { %602 = vmatprep.subr.bf16.mxu0 %v799_v0 }
  0x8c   :  { %603 = vmatpush3.bf16.msra.mxu0 %v644_v54 }
  0x8d   :  { %604 = vmatprep.subr.bf16.mxu0 %v799_v0 }
  0x90   :  { %605 = vmatpush3.bf16.msra.mxu0 %v645_v55 }
  0x91   :  { %606 = vmatprep.subr.bf16.mxu0 %v799_v0 }
  0x94   :  { %607 = vmatpush3.bf16.msra.mxu0 %v646_v56 }
  0x95   :  { %608 = vmatprep.subr.bf16.mxu0 %v799_v0  ;;  %v517_v0 = vld [vmem:[%s969_s4 + $0x2] ss:$0 sm:$0xff] }
  0x98   :  { %609 = vmatpush3.bf16.msra.mxu0 %v647_v57 }
 0x14e   :  { %v196_v11 = vpop.f32.mrb[0].mxu0 }
 0x14f   :  { %v197_v12 = vadd.f32 %v496_v10, %v196_v11  ;;  %v572_v13 = vpop.f32.mrb[1].mxu0  ;;  %v518_v10 = vld [vmem:[%s971_s6] ss:$0 sm:$0xff] }
 0x150   :  { %v199_v14 = vpop.f32.mrb[2].mxu0 }
 0x151   :  { %v202_v15 = vmax.f32 %v197_v12, 0.0  ;;  %v573_v16 = vpop.f32.mrb[3].mxu0 }
 0x153   :  { %203 = vadd.xlane.f32.xlu0 %v202_v15  ;;  %v206_v17 = vmul.f32 %v202_v15, %v202_v15 }
 0x157   :  { %207 = vadd.xlane.f32.xlu0 %v206_v17 }
 0x1e0   :  { %v204_v26 = vpop.xlane.xlu0 %203 }
 0x1e1   :  { %v205_v27 = vmul.f32 0.03125, %v204_v26 }
 0x1e3   :  { %v210_v29 = vmul.f32 %v205_v27, %v205_v27  ;;  %v213_v34 = vsub.f32 %v202_v15, %v205_v27 }
 0x1e4   :  { %v208_v28 = vpop.xlane.xlu0 %207 }
 0x1e5   :  { %v209_v30 = vmul.f32 0.03125, %v208_v28 }
 0x1e7   :  { %v211_v31 = vsub.f32 %v209_v30, %v210_v29 }
 0x1e9   :  { %v212_v32 = vmax.f32 %v211_v31, 0.0 }
 0x1eb   :  { %v214_v33 = vadd.f32 1e-05, %v212_v32 }
 0x1ed   :  { %648 = vrsqrt.f32 %v214_v33 }
 0x1f7   :  { %v649_v35 = vpop.eup %648 }
 0x1f8   :  { %v216_v37 = vmul.f32 %v649_v35, %v213_v34 }
 0x1fa   :  { %v222_v39 = vmul.f32 %v505_v36, %v216_v37 }
 0x1fc   :  { %v228_v40 = vadd.f32 %v506_v38, %v222_v39 }
 0x1fe   :  { %v229_v41 = vpack.c.bf16 %v228_v40, %v228_v40 }
 0x200   :  { %591 = vmatmul.mubr.bf16.vlgmr.msra.gmra.mrb[0].mxu1 %v229_v41 }
 0x2d3   :  { %v333_v43 = vpop.f32.mrb[0].mxu1 }
 0x2d4   :  { %v334_v44 = vadd.f32 %v507_v42, %v333_v43  ;;  %v592_v45 = vpop.f32.mrb[1].mxu1 }
 0x2d5   :  { %v336_v46 = vpop.f32.mrb[2].mxu1 }
 0x2d6   :  { %v339_v47 = vmax.f32 %v334_v44, 0.0  ;;  %v593_v48 = vpop.f32.mrb[3].mxu1 }
 0x2d8   :  { %340 = vadd.xlane.f32.xlu1 %v339_v47  ;;  %v343_v49 = vmul.f32 %v339_v47, %v339_v47 }
 0x2dc   :  { %344 = vadd.xlane.f32.xlu1 %v343_v49 }
 0x365   :  { %v341_v58 = vpop.xlane.xlu1 %340 }
 0x366   :  { %v342_v59 = vmul.f32 0.015625, %v341_v58 }
 0x368   :  { %v347_v61 = vmul.f32 %v342_v59, %v342_v59  ;;  %v350_v3 = vsub.f32 %v339_v47, %v342_v59 }
 0x369   :  { %v345_v60 = vpop.xlane.xlu1 %344 }
 0x36a   :  { %v346_v62 = vmul.f32 0.015625, %v345_v60 }
 0x36c   :  { %v348_v63 = vsub.f32 %v346_v62, %v347_v61 }
 0x36e   :  { %v349_v1 = vmax.f32 %v348_v63, 0.0 }
 0x370   :  { %v351_v2 = vadd.f32 1e-05, %v349_v1 }
 0x372   :  { %650 = vrsqrt.f32 %v351_v2 }
 0x37c   :  { %v651_v4 = vpop.eup %650 }
 0x37d   :  { %v353_v6 = vmul.f32 %v651_v4, %v350_v3 }
 0x37f   :  { %v359_v7 = vmul.f32 %v516_v5, %v353_v6 }
 0x381   :  { %v365_v8 = vadd.f32 %v517_v0, %v359_v7 }
 0x383   :  { %v366_v9 = vpack.c.bf16 %v365_v8, %v365_v8 }
 0x385   :  { %611 = vmatmul.mubr.bf16.vlgmr.msra.gmra.mrb[4].mxu0 %v366_v9 }
 0x458   :  { %v472_v11 = vpop.f32.mrb[4].mxu0 }
 0x459   :  { %v473_v12 = vadd.f32 %v518_v10, %v472_v11  ;;  %v612_v13 = vpop.f32.mrb[5].mxu0 }
 0x45a   :  { %v475_v14 = vpop.f32.mrb[6].mxu0 }
 0x45b   :  { %478 = vst [vmem:[#allocation11] sm:$0xff] %v473_v12  ;;  %v613_v15 = vpop.f32.mrb[7].mxu0 }
 0x45c   :  { %773 = shalt.err (!%p770_p2)
}
 0x45d   :  { %s774_s6 = scalar_lea.hbm %s972_s7, 128 }
 0x45e   :  { %p775_p3 = scmp.ne.s32.totalorder %s972_s7, %s774_s6  ;;  %p778_p4 = scmp.lt.u32.totalorder %s774_s6, %s972_s7 }
 0x460   :  { %p780_p5 = pnand %p778_p4, %p775_p3 }
 0x462   :  { %783 = shalt.err (!%p780_p5)
}
 0x463   :  { %488 = dma.vmem_to_hbm [thread:$0]  %s486_s22, 128, %s972_s7, [#allocation4]  }
 0x464   :  { %790 = dma.done.wait [#allocation4], 128  }
 0x465   :  { %791 = vsyncadd [#allocation4], 4294967168 }
 0x466   :  { %492 = vsyncpa [#allocation3], 1 }
 0x467   :  { %493 = vsyncpa [#allocation6], 1 }
 0x468   :  { %494 = vsyncpa [#allocation9], 1 }
 0x469   :  { %495 = vsyncpa [#allocation4], 1 }

</bundles_post_ra>
